<compile_context>
chip_gen: v6e
topology: v6e:2x2x1
jax: 0.10.0
libtpu: 0.0.40
codegen_flags: <defaults>
</compile_context>

<pallas_src>
import functools
import math
from itertools import accumulate

import jax
import jax.numpy as jnp
from jax.experimental import pallas as pl
from jax.experimental.pallas import tpu as pltpu


# ----------------------------------------------------------------------------
# Chip-aware VMEM budget
# ----------------------------------------------------------------------------
@functools.lru_cache(maxsize=1)
def _vmem_budget_bytes() -> int:
    phys = None
    try:
        phys = int(pltpu.get_tpu_info().vmem_capacity_bytes)
    except Exception:
        phys = None
    if not phys or phys <= 0:
        phys = 64 * 1024 * 1024  # assume the smallest generation (v7x per-TC)
    # ~75% of physical: leaves headroom for compiler-internal scratch/semaphores.
    return max((phys * 3) // 4, 32 * 1024 * 1024)


# ----------------------------------------------------------------------------
# Kernels
# ----------------------------------------------------------------------------
def _matmul_kernel(x_ref, w_ref, o_ref, acc_ref):
    """One (tm, tn) output tile, f32 accumulation over the K grid axis.

    x_ref: (tm, tk)   activations
    w_ref: (tk, tn)   weight, already transposed to (in, out) layout
    o_ref: (tm, tn)   output tile
    acc_ref: (tm, tn) float32 accumulator (resident across K steps)
    """
    @pl.when(pl.program_id(2) == 0)
    def _init():
        acc_ref[...] = jnp.zeros_like(acc_ref)

    acc_ref[...] += jnp.dot(x_ref[...], w_ref[...],
                            preferred_element_type=jnp.float32)

    @pl.when(pl.program_id(2) == pl.num_programs(2) - 1)
    def _store():
        o_ref[...] = acc_ref[...].astype(o_ref.dtype)


def _matmul_kernel_f32_out(x_ref, w_ref, o_ref):
    """float32 output: accumulate directly into the resident output block."""
    @pl.when(pl.program_id(2) == 0)
    def _init():
        o_ref[...] = jnp.zeros_like(o_ref)

    o_ref[...] += jnp.dot(x_ref[...], w_ref[...],
                          preferred_element_type=jnp.float32)


def _gate_up_silu_kernel(x_ref, wg_ref, wu_ref, o_ref, accg_ref, accu_ref):
    """Fused gate/up projection with silu(gate)*up epilogue at the last K step."""
    @pl.when(pl.program_id(2) == 0)
    def _init():
        accg_ref[...] = jnp.zeros_like(accg_ref)
        accu_ref[...] = jnp.zeros_like(accu_ref)

    x = x_ref[...]
    accg_ref[...] += jnp.dot(x, wg_ref[...], preferred_element_type=jnp.float32)
    accu_ref[...] += jnp.dot(x, wu_ref[...], preferred_element_type=jnp.float32)

    @pl.when(pl.program_id(2) == pl.num_programs(2) - 1)
    def _store():
        g = accg_ref[...]
        o_ref[...] = (g * jax.nn.sigmoid(g) * accu_ref[...]).astype(o_ref.dtype)


# ----------------------------------------------------------------------------
# Tile selection
# ----------------------------------------------------------------------------
def _pick_tile(dim: int, candidates) -> int:
    for c in candidates:
        if dim >= c and dim % c == 0:
            return c
    return dim  # full-extent block is always layout-legal


def _choose_tiles(M, N, K, x_sz, w_sz, o_sz, *, n_weights=1):
    budget = _vmem_budget_bytes()
    tm = _pick_tile(M, (512, 256, 128))
    tn = _pick_tile(N, (1024, 512, 256, 128))
    tk = _pick_tile(K, (2048, 1024, 512, 256, 128))

    # Decode regime (single M block): make sure the "parallel" N axis has >= 2
    # blocks so both v7x TensorCores get work.
    if M // tm == 1:
        while N // tn < 2 and tn > 128 and tn % 2 == 0 and (tn // 2) % 128 == 0:
            tn //= 2

    def working_set(tm_, tn_, tk_):
        # double-buffered inputs + double-buffered output + f32 accumulators
        return (2 * (tm_ * tk_ * x_sz + n_weights * tk_ * tn_ * w_sz)
                + 2 * tm_ * tn_ * o_sz + n_weights * tm_ * tn_ * 4)

    while working_set(tm, tn, tk) > budget and tk > 128 and tk % 2 == 0 \
            and (tk // 2) % 128 == 0:
        tk //= 2
    while working_set(tm, tn, tk) > budget and tn > 128 and tn % 2 == 0 \
            and (tn // 2) % 128 == 0:
        tn //= 2
    return tm, tn, tk


# ----------------------------------------------------------------------------
# Cached pallas_call builders
# ----------------------------------------------------------------------------
@functools.lru_cache(maxsize=None)
def _build_linear(M, N, K, x_dtype, w_dtype, out_dtype, tm, tn, tk):
    x_dt, w_dt, o_dt = jnp.dtype(x_dtype), jnp.dtype(w_dtype), jnp.dtype(out_dtype)
    grid = (M // tm, N // tn, K // tk)

    x_bytes = M * K * x_dt.itemsize
    w_bytes = K * N * w_dt.itemsize
    o_bytes = M * N * o_dt.itemsize
    cost = pl.CostEstimate(
        flops=2 * M * N * K,
        transcendentals=0,
        bytes_accessed=x_bytes * (N // tn) + w_bytes * (M // tm) + o_bytes,
    )

    if o_dt == jnp.dtype(jnp.float32):
        kernel, scratch = _matmul_kernel_f32_out, []
    else:
        kernel, scratch = _matmul_kernel, [pltpu.VMEM((tm, tn), jnp.float32)]

    call = pl.pallas_call(
        kernel,
        out_shape=jax.ShapeDtypeStruct((M, N), o_dt),
        grid_spec=pltpu.PrefetchScalarGridSpec(
            num_scalar_prefetch=0,
            grid=grid,
            in_specs=[
                pl.BlockSpec((tm, tk), lambda i, j, k: (i, k)),  # activations
                pl.BlockSpec((tk, tn), lambda i, j, k: (k, j)),  # weight (K, N)
            ],
            out_specs=pl.BlockSpec((tm, tn), lambda i, j, k: (i, j)),
            scratch_shapes=scratch,
        ),
        compiler_params=pltpu.CompilerParams(
            dimension_semantics=("parallel", "parallel", "arbitrary"),
            vmem_limit_bytes=_vmem_budget_bytes(),
        ),
        cost_estimate=cost,
    )
    return jax.jit(call)


@functools.lru_cache(maxsize=None)
def _build_gate_up_silu(M, N, K, x_dtype, w_dtype, out_dtype, tm, tn, tk):
    x_dt, w_dt, o_dt = jnp.dtype(x_dtype), jnp.dtype(w_dtype), jnp.dtype(out_dtype)
    grid = (M // tm, N // tn, K // tk)

    x_bytes = M * K * x_dt.itemsize
    w_bytes = K * N * w_dt.itemsize          # per weight (gate or up)
    o_bytes = M * N * o_dt.itemsize
    cost = pl.CostEstimate(
        flops=4 * M * N * K + 3 * M * N,
        transcendentals=M * N,
        bytes_accessed=x_bytes * (N // tn) + 2 * w_bytes * (M // tm) + o_bytes,
    )

    call = pl.pallas_call(
        _gate_up_silu_kernel,
        out_shape=jax.ShapeDtypeStruct((M, N), o_dt),
        grid_spec=pltpu.PrefetchScalarGridSpec(
            num_scalar_prefetch=0,
            grid=grid,
            in_specs=[
                pl.BlockSpec((tm, tk), lambda i, j, k: (i, k)),  # activations
                pl.BlockSpec((tk, tn), lambda i, j, k: (k, j)),  # gate weight (K, N)
                pl.BlockSpec((tk, tn), lambda i, j, k: (k, j)),  # up weight   (K, N)
            ],
            out_specs=pl.BlockSpec((tm, tn), lambda i, j, k: (i, j)),
            scratch_shapes=[pltpu.VMEM((tm, tn), jnp.float32),
                            pltpu.VMEM((tm, tn), jnp.float32)],
        ),
        compiler_params=pltpu.CompilerParams(
            dimension_semantics=("parallel", "parallel", "arbitrary"),
            vmem_limit_bytes=_vmem_budget_bytes(),
        ),
        cost_estimate=cost,
    )
    return jax.jit(call)


# ----------------------------------------------------------------------------
# Python wrappers
# ----------------------------------------------------------------------------
def linear_no_bias(x, weight_t, *, out_dtype=None, tm=None, tn=None, tk=None):
    """y = x @ weight_t, where weight_t is the pre-transposed (in, out) weight.

    Equivalent to PyTorch `nn.Linear(in, out, bias=False)(x)` whose weight is
    `weight_t.T`.
    """
    orig_shape = x.shape
    K = orig_shape[-1]
    K_w, N = weight_t.shape
    assert K == K_w, (x.shape, weight_t.shape)
    M = int(math.prod(orig_shape[:-1])) if len(orig_shape) > 1 else 1
    x2 = x.reshape(M, K)
    o_dt = jnp.dtype(out_dtype or x.dtype)

    atm, atn, atk = _choose_tiles(M, N, K,
                                  jnp.dtype(x2.dtype).itemsize,
                                  jnp.dtype(weight_t.dtype).itemsize,
                                  o_dt.itemsize, n_weights=1)
    tm, tn, tk = tm or atm, tn or atn, tk or atk
    assert M % tm == 0 and N % tn == 0 and K % tk == 0, (M, N, K, tm, tn, tk)

    fn = _build_linear(M, N, K,
                       jnp.dtype(x2.dtype).name, jnp.dtype(weight_t.dtype).name,
                       o_dt.name, tm, tn, tk)
    out = fn(x2, weight_t)
    return out.reshape(*orig_shape[:-1], N)


def gate_up_silu(x, gate_t, up_t, *, out_dtype=None):
    """silu(x @ gate_t) * (x @ up_t), fused in one Pallas kernel."""
    orig_shape = x.shape
    K = orig_shape[-1]
    K_g, N = gate_t.shape
    assert gate_t.shape == up_t.shape and K == K_g
    M = int(math.prod(orig_shape[:-1])) if len(orig_shape) > 1 else 1
    x2 = x.reshape(M, K)
    o_dt = jnp.dtype(out_dtype or x.dtype)

    tm, tn, tk = _choose_tiles(M, N, K,
                               jnp.dtype(x2.dtype).itemsize,
                               jnp.dtype(gate_t.dtype).itemsize,
                               o_dt.itemsize, n_weights=2)
    assert M % tm == 0 and N % tn == 0 and K % tk == 0, (M, N, K, tm, tn, tk)

    fn = _build_gate_up_silu(M, N, K,
                             jnp.dtype(x2.dtype).name, jnp.dtype(gate_t.dtype).name,
                             o_dt.name, tm, tn, tk)
    out = fn(x2, gate_t, up_t)
    return out.reshape(*orig_shape[:-1], N)


# ----------------------------------------------------------------------------
# JAX mirrors of the tensor-parallel layers (single-rank local compute)
# ----------------------------------------------------------------------------
def _linear_init(key, out_features, in_features, dtype):
    # nn.Linear default init: U(-1/sqrt(fan_in), 1/sqrt(fan_in))
    bound = 1.0 / math.sqrt(in_features)
    w = jax.random.uniform(key, (out_features, in_features), dtype=jnp.float32,
                           minval=-bound, maxval=bound)
    return w.astype(dtype)


class RowParallelLayerJAX:
    """RowParallelLayer: Linear(row_size // world_size -> col_size, bias=False)."""

    def __init__(self, row_size, col_size, world_size, rank, key,
                 dtype=jnp.bfloat16):
        assert row_size % world_size == 0
        self.world_size, self.rank = world_size, rank
        self.in_local, self.col_size = row_size // world_size, col_size
        w = _linear_init(key, col_size, self.in_local, dtype)   # (out, in)
        self.weight_t = jnp.asarray(w.T)                        # (in, out), once

    def __call__(self, x):
        # TODO(synk): the cross-rank all_reduce that follows in the torch model
        # is done by ray; only the local shard is computed here.
        return linear_no_bias(x.astype(self.weight_t.dtype), self.weight_t)


class MergeParallelLayerJAX:
    """MergeParallelLayer: fused gate/up projection, chunked along last dim."""

    def __init__(self, row_size, col_size, dup_layer, world_size, rank, key,
                 dtype=jnp.bfloat16):
        assert col_size % world_size == 0
        self.dup_layer = dup_layer
        out_local = col_size * dup_layer // world_size
        w = _linear_init(key, out_local, row_size, dtype)       # (out, in)
        self.weight_t = jnp.asarray(w.T)                        # (in, out)

    def __call__(self, x):
        y = linear_no_bias(x.astype(self.weight_t.dtype), self.weight_t)
        return tuple(jnp.split(y, self.dup_layer, axis=-1))


class QKVParallelLayerJAX:
    """QKVParallelLayer: fused q/k/v projection, split by per-rank col sizes."""

    def __init__(self, row_size, col_size_list, world_size, rank, key,
                 dtype=jnp.bfloat16):
        for c in col_size_list:
            assert c % world_size == 0
        self.col_size_list = [c // world_size for c in col_size_list]
        out_local = sum(self.col_size_list)
        w = _linear_init(key, out_local, row_size, dtype)       # (out, in)
        self.weight_t = jnp.asarray(w.T)                        # (in, out)

    def __call__(self, x):
        # TODO(synk): avoid the post-matmul split by partitioning the N axis
        # across multiple out_specs.
        y = linear_no_bias(x.astype(self.weight_t.dtype), self.weight_t)
        split_points = list(accumulate(self.col_size_list))[:-1]
        return tuple(jnp.split(y, split_points, axis=-1))


class MyLlamaMLPJAX:
    """MyLlamaMLP local-shard path with the silu(gate)*up epilogue fused."""

    def __init__(self, hidden_size, intermediate_size, world_size, rank, key,
                 dtype=jnp.bfloat16):
        kg, kd = jax.random.split(key)
        self.gate_up_proj = MergeParallelLayerJAX(
            hidden_size, intermediate_size, 2, world_size, rank, kg, dtype)
        self.down_proj = RowParallelLayerJAX(
            intermediate_size, hidden_size, world_size, rank, kd, dtype)
        inter_local = self.gate_up_proj.weight_t.shape[1] // 2
        # One-time slices of the merged (in, out) weight into gate / up halves.
        self.gate_t = jnp.asarray(self.gate_up_proj.weight_t[:, :inter_local])
        self.up_t = jnp.asarray(self.gate_up_proj.weight_t[:, inter_local:])

    def __call__(self, x):
        inter = gate_up_silu(x.astype(self.gate_t.dtype), self.gate_t, self.up_t)
        # TODO(synk): ray-based cross-rank all_reduce of the down_proj output.
        return self.down_proj(inter)


# ----------------------------------------------------------------------------
# Demo / correctness check
# ----------------------------------------------------------------------------
if __name__ == "__main__":
    key = jax.random.PRNGKey(0)
    k_qkv, k_mlp, k_row, k_x1, k_x2 = jax.random.split(key, 5)

    # Tiny TP=2 Llama-like config.
    world_size, rank = 2, 0
    hidden, intermediate = 256, 512
    num_heads, num_kv_heads, head_dim = 8, 4, 32
    bsz, q_len = 2, 8
    dtype = jnp.bfloat16

    hidden_states = jax.random.normal(
        k_x1, (bsz, q_len, hidden), dtype=jnp.float32).astype(dtype)
    x2_f32 = hidden_states.reshape(-1, hidden).astype(jnp.float32)

    # --- QKVParallelLayer (attention qkv_proj) ------------------------------
    qkv = QKVParallelLayerJAX(
        hidden,
        [num_heads * head_dim, num_kv_heads * head_dim, num_kv_heads * head_dim],
        world_size, rank, k_qkv, dtype=dtype)
    q, k_, v = qkv(hidden_states)
    qkv_ref = x2_f32 @ qkv.weight_t.astype(jnp.float32)
    qkv_out = jnp.concatenate([q, k_, v], axis=-1).reshape(qkv_ref.shape)
    assert q.shape == (bsz, q_len, num_heads * head_dim // world_size)
    assert k_.shape == (bsz, q_len, num_kv_heads * head_dim // world_size)
    assert jnp.allclose(qkv_out.astype(jnp.float32), qkv_ref, atol=5e-2, rtol=5e-2)

    # --- MergeParallelLayer (unfused, matches torch forward semantics) ------
    mlp = MyLlamaMLPJAX(hidden, intermediate, world_size, rank, k_mlp, dtype=dtype)
    gate_out, up_out = mlp.gate_up_proj(hidden_states)
    gu_ref = x2_f32 @ mlp.gate_up_proj.weight_t.astype(jnp.float32)
    gu_out = jnp.concatenate([gate_out, up_out], axis=-1).reshape(gu_ref.shape)
    assert gate_out.shape == (bsz, q_len, intermediate // world_size)
    assert jnp.allclose(gu_out.astype(jnp.float32), gu_ref, atol=5e-2, rtol=5e-2)

    # --- Fused MLP: silu(gate)*up inside the matmul epilogue + down_proj ----
    y_mlp = mlp(hidden_states)
    g_ref, u_ref = jnp.split(gu_ref, 2, axis=-1)
    inter_ref = jax.nn.silu(g_ref) * u_ref
    y_mlp_ref = inter_ref @ mlp.down_proj.weight_t.astype(jnp.float32)
    assert y_mlp.shape == (bsz, q_len, hidden)
    assert jnp.allclose(y_mlp.reshape(y_mlp_ref.shape).astype(jnp.float32),
                        y_mlp_ref, atol=5e-2, rtol=5e-2)

    # --- f32 path + explicit tiling: exercise K accumulation into the
    #     resident output block (no acc scratch) and N tiling ----------------
    row = RowParallelLayerJAX(1024, 256, world_size, rank, k_row, dtype=jnp.float32)
    x_small = jax.random.normal(k_x2, (8, 512), dtype=jnp.float32)   # decode-sized M
    y_tiled = linear_no_bias(x_small, row.weight_t, tm=8, tn=128, tk=128)  # grid (1,2,4)
    y_tiled_ref = x_small @ row.weight_t
    assert y_tiled.shape == (8, 256)
    assert jnp.allclose(y_tiled, y_tiled_ref, atol=2e-3, rtol=2e-3)

    jax.block_until_ready((q, k_, v, gate_out, up_out, y_mlp, y_tiled))
    print("KERNEL_OK")
</pallas_src>

<mosaic_0001>
module attributes {stable_mosaic.version = 11 : i64} {
  func.func @_matmul_kernel(%arg0: i32, %arg1: i32, %arg2: i32, %arg3: memref<16x256xbf16, #tpu.memory_space<vmem>>, %arg4: memref<256x128xbf16, #tpu.memory_space<vmem>>, %arg5: memref<16x128xbf16, #tpu.memory_space<vmem>>, %arg6: memref<16x128xf32, #tpu.memory_space<vmem>>) attributes {dimension_semantics = [#tpu.dimension_semantics<parallel>, #tpu.dimension_semantics<parallel>, #tpu.dimension_semantics<arbitrary>], iteration_bounds = array<i64: 1, 2, 1>, scalar_prefetch = 0 : i64, scratch_operands = 1 : i64, tpu.core_type = #tpu.core_type<tc>, window_params = [{transform_indices = @transform_0, window_bounds = array<i64: 16, 256>}, {transform_indices = @transform_1, window_bounds = array<i64: 256, 128>}, {transform_indices = @transform_2, window_bounds = array<i64: 16, 128>}]} {
    %c0_i32 = arith.constant 0 : i32
    %0 = arith.cmpi eq, %arg2, %c0_i32 : i32
    %1 = arith.extui %0 : i1 to i32
    %c0_i32_0 = arith.constant 0 : i32
    %2 = arith.cmpi ne, %1, %c0_i32_0 : i32
    scf.if %2 {
      %cst_10 = arith.constant 0.000000e+00 : f32
      %12 = vector.broadcast %cst_10 : f32 to vector<16x128xf32>
      %c0_11 = arith.constant 0 : index
      %c0_12 = arith.constant 0 : index
      %13 = vector.load %arg6[%c0_11, %c0_12] : memref<16x128xf32, #tpu.memory_space<vmem>>, vector<16x128xf32>
      tpu.vector_store %arg6[%c0_11, %c0_12], %12 {strides = array<i32>} : memref<16x128xf32, #tpu.memory_space<vmem>>, vector<16x128xf32>,
    } else {
    }
    %c0 = arith.constant 0 : index
    %c0_1 = arith.constant 0 : index
    %3 = vector.load %arg6[%c0, %c0_1] : memref<16x128xf32, #tpu.memory_space<vmem>>, vector<16x128xf32>
    %c0_2 = arith.constant 0 : index
    %c0_3 = arith.constant 0 : index
    %4 = vector.load %arg3[%c0_2, %c0_3] : memref<16x256xbf16, #tpu.memory_space<vmem>>, vector<16x256xbf16>
    %c0_4 = arith.constant 0 : index
    %c0_5 = arith.constant 0 : index
    %5 = vector.load %arg4[%c0_4, %c0_5] : memref<256x128xbf16, #tpu.memory_space<vmem>>, vector<256x128xbf16>
    %cst = arith.constant dense<0.000000e+00> : vector<16x128xf32>
    %6 = tpu.matmul %4, %5, %cst {dimension_numbers = #tpu.dot_dimension_numbers<[1], [0], [0], [1], [0, 0, 1, 1], [], []>} : vector<16x256xbf16>, vector<256x128xbf16>, vector<16x128xf32> -> vector<16x128xf32>
    %7 = arith.addf %3, %6 : vector<16x128xf32>
    %c0_6 = arith.constant 0 : index
    %c0_7 = arith.constant 0 : index
    %8 = vector.load %arg6[%c0_6, %c0_7] : memref<16x128xf32, #tpu.memory_space<vmem>>, vector<16x128xf32>
    tpu.vector_store %arg6[%c0_6, %c0_7], %7 {strides = array<i32>} : memref<16x128xf32, #tpu.memory_space<vmem>>, vector<16x128xf32>,
    %c0_i32_8 = arith.constant 0 : i32
    %9 = arith.cmpi eq, %arg2, %c0_i32_8 : i32
    %10 = arith.extui %9 : i1 to i32
    %c0_i32_9 = arith.constant 0 : i32
    %11 = arith.cmpi ne, %10, %c0_i32_9 : i32
    scf.if %11 {
      %c0_10 = arith.constant 0 : index
      %c0_11 = arith.constant 0 : index
      %12 = vector.load %arg6[%c0_10, %c0_11] : memref<16x128xf32, #tpu.memory_space<vmem>>, vector<16x128xf32>
      %13 = arith.truncf %12 : vector<16x128xf32> to vector<16x128xbf16>
      %c0_12 = arith.constant 0 : index
      %c0_13 = arith.constant 0 : index
      %14 = vector.load %arg5[%c0_12, %c0_13] : memref<16x128xbf16, #tpu.memory_space<vmem>>, vector<16x128xbf16>
      tpu.vector_store %arg5[%c0_12, %c0_13], %13 {strides = array<i32>} : memref<16x128xbf16, #tpu.memory_space<vmem>>, vector<16x128xbf16>,
    } else {
    }
    return
  }
  func.func @transform_0(%arg0: i32, %arg1: i32, %arg2: i32) -> (i32, i32) {
    %c0_i32 = arith.constant 0 : i32
    return %arg0, %arg2 : i32, i32
  }
  func.func @transform_1(%arg0: i32, %arg1: i32, %arg2: i32) -> (i32, i32) {
    %c0_i32 = arith.constant 0 : i32
    return %arg2, %arg1 : i32, i32
  }
  func.func @transform_2(%arg0: i32, %arg1: i32, %arg2: i32) -> (i32, i32) {
    %c0_i32 = arith.constant 0 : i32
    return %arg0, %arg1 : i32, i32
  }
}

</mosaic_0001>

<bundles_post_ra>
// kernel: tpu_custom_call.1
= control target key start
LH: loop header
LB: loop body
LE: loop exit
PB: predicated region body
PF: predicated region fallthrough
CT: control target
= control target key end

     0   :  { %7 = vsyncpa [#allocation4], 0  ;;  %s1074_s0 = inlined_call_operand.hbm [shape: bf16[16,256], index: 0, kind: input, shape index: {}]   ;;  %s1075_s1 = inlined_call_operand.hbm [shape: bf16[256,256], index: 1, kind: input, shape index: {}]   ;;  %s1076_s2 = inlined_call_operand.hbm [shape: bf16[16,256], index: 2, kind: output, shape index: {}]  }
   0x1   :  { %8 = vsyncpa [#allocation7], 0 }
   0x2   :  { %10 = vsyncpa [#allocation7 + $0x1], 0 }
   0x3   :  { %11 = vsyncpa [#allocation5], 0 }
   0x4   :  { %13 = vsyncpa [#allocation5 + $0x1], 0  ;;  %s877_s9 = smov 0   ;;  %s879_s10 = smov 0  }
   0x5   :  { %s881_s11 = smov 0   ;;  %s883_s12 = smov 0  }
   0x6   :  { %s885_s13 = smov 0   ;;  %s887_s14 = smov 0  }
   0x7 LB: > { %1081 = sst [smem:[#allocation12_spill]] %s850_s14  ;;  %s549_s15 = sadd.s32 4294967295, %s850_s14   ;;  %s850_s14 = sphi %s887_s14, %s1100_s14   ;;  %s846_s13 = sphi %s885_s13, %s1099_s13   ;;  %s842_s12 = sphi %s883_s12, %s1098_s12   ;;  %s838_s11 = sphi %s881_s11, %s1097_s11   ;;  %s834_s10 = sphi %s879_s10, %s1096_s10   ;;  %s830_s9 = sphi %s877_s9, %s1095_s9  }
   0x8   : > { %s550_s16 = sadd.s32 4294967294, %s850_s14   ;;  %p82_p0 = scmp.ne.s32.totalorder %s838_s11, %s834_s10 }
   0x9   : > { %p83_p1 = scmp.eq.s32.totalorder %s850_s14, 0  ;;  %p88_p2 = scmp.ne.s32.totalorder %s834_s10, %s830_s9 }
   0xa   : > { %p914_p3 = scmp.eq.s32.totalorder %s549_s15, 0  ;;  %p114_p5 = scmp.eq.s32.totalorder %s549_s15, 1 }
   0xb   : > { %p918_p4 = por %p83_p1, %p82_p0  ;;  %p120_p7 = scmp.eq.s32.totalorder %s550_s16, 1 }
   0xc   : > { %p924_p6 = por %p914_p3, %p88_p2  ;;  %p928_p8 = por %p114_p5, %p82_p0 }
   0xd   : > { %p551_p9 = scmp.ge.s32.totalorder %s850_s14, 1  ;;  %p933_p10 = por %p120_p7, %p88_p2 }
   0xe   : > { %s1084_s19 = scalar_select %p924_p6, 1, 0 }
   0xf   : > { %s1085_s20 = scalar_select %p928_p8, 1, 0 }
  0x10   : > { %s1086_s21 = scalar_select %p933_p10, 1, 0 }
  0x11   : > { %p127_p11 = scmp.lt.s32.totalorder %s850_s14, 3  ;;  %s852_s23 = smov [#allocation3]  }
  0x12   : > { %s145_s24 = sshll.u32 %s852_s23, 4  ;;  %p634_p1 = scmp.lt.s32.totalorder %s850_s14, 2  ;;  %s146_s24 = int_to_ptr.vmem [resolvable:$true] %s145_s24 }
  0x13   : > { %p938_p12 = pnand %p551_p9, %p127_p11  ;;  %s34_s27 = sadd.s32 1, %s846_s13 }
  0x14   : > { %p954_p2 = pnand %p634_p1, %p918_p4  ;;  %s723_s28 = scalar_lea.vmem %s146_s24, 256 }
  0x15   : > { %p621_p13 = pneg %p938_p12  ;;  %p724_p9 = scmp.ne.s32.totalorder %s146_s24, %s723_s28 }
  0x16   : > { %p731_p0 = scmp.lt.s32.totalorder %s146_s24, %s146_s24  ;;  %p732_p8 = scmp.lt.s32.totalorder %s723_s28, %s723_s28 }
  0x17   : > { %p948_p5 = pnand %p621_p13, %p914_p3 }
  0x18   : > { %p733_p6 = por %p732_p8, %p731_p0 }
  0x19   : > { %p714_p7 = pneg %p948_p5 }
  0x1b   : > { %p726_p11 = pnand %p724_p9, %p714_p7 }
  0x1d   : > { %p727_p10 = pneg %p726_p11 }
  0x1f   : > { %p734_p13 = pnand %p733_p6, %p727_p10 }
  0x21   : > { %737 = shalt.err (!%p734_p13)
}
  0x22   : > { %s853_s29 = smov 128   ;;  %s854_s30 = smov 8  }
  0x23   : > { %624 = dma.hbm_to_vmem [thread:$0]  (!%p948_p5), %s1074_s0, 256, %s146_s24, [#allocation4], %s853_s29, %s853_s29, %s854_s30  }
  0x24   : > { %p36_p4 = scmp.ge.s32.totalorder %s34_s27, 2  ;;  %s75_s5 = sadd.s32 1, %s838_s11 }
  0x25   : > { %s159_s6 = sand.u32 1, %s838_s11   ;;  %s555_s15 = sshll.u32 %s846_s13, 6 }
  0x26   : > { %s1102_s27 = smov (%p36_p4, %s34_s27), 0  ;;  %s554_s7 = sshll.u32 %s159_s6, 7 }
  0x27   : > { %s71_s8 = ssub.s32 %s846_s13, %s1102_s27  ;;  %s171_s23 = scalar_lea.hbm %s1075_s1, %s555_s15 }
  0x28   : > { %p73_p6 = scmp.eq.s32.totalorder %s71_s8, 0  ;;  %s163_s25 = scalar_lea.vmem [#allocation6], %s554_s7 }
  0x29   : > { %s172_s28 = sshll.u32 %s163_s25, 4  ;;  %s160_s24 = scalar_lea.sflag [#allocation7], %s159_s6  ;;  %s173_s28 = int_to_ptr.vmem [resolvable:$true] %s172_s28 }
  0x2a   : > { %s979_s14 = scalar_select %p73_p6, %s838_s11, %s75_s5  }
  0x2b   : > { %p740_p8 = pneg %p954_p2  ;;  %s751_s30 = scalar_lea.vmem %s173_s28, 2048 }
  0x2c   : > { %p752_p10 = scmp.ne.s32.totalorder %s173_s28, %s751_s30  ;;  %s855_s3 = smov [#allocation6]  }
  0x2d   : > { %s756_s4 = sshll.u32 %s855_s3, 4  ;;  %s757_s4 = int_to_ptr.vmem [resolvable:$false] %s756_s4 }
  0x2e   : > { %p754_p0 = pnand %p752_p10, %p740_p8  ;;  %s758_s8 = scalar_lea.vmem %s757_s4, 4096 }
  0x2f   : > { %p759_p5 = scmp.lt.s32.totalorder %s173_s28, %s757_s4  ;;  %p760_p7 = scmp.lt.s32.totalorder %s758_s8, %s751_s30 }
  0x30   : > { %p755_p1 = pneg %p754_p0 }
  0x31   : > { %p761_p9 = por %p760_p7, %p759_p5 }
  0x33   : > { %p762_p11 = pnand %p761_p9, %p755_p1 }
  0x35   : > { %765 = shalt.err (!%p762_p11)
}
  0x36   : > { %s856_s7 = smov 64   ;;  %s857_s5 = smov 4  }
  0x37   : > { %628 = dma.hbm_to_vmem [thread:$0]  (!%p954_p2), %s171_s23, 2048, %s173_s28, %s160_s24, %s853_s29, %s856_s7, %s857_s5  }
  0x38   : > { %184 = sbr.rel (%p938_p12) target bundleno = 317 (0x13d), region = 28 }
  0x3d   : > { %817 = dma.done.wait (%p914_p3), [#allocation4], 256  }
  0x3e   : > { %819 = vsyncadd (%p914_p3), [#allocation4], 4294967040  ;;  %s993_s6 = sand.u32 1, %s834_s10   ;;  %p1090_p2 = scmp.ne.s32.totalorder %s1084_s19, 0 }
  0x3f   : > { %s558_s15 = sshll.u32 %s993_s6, 7  ;;  %s191_s16 = scalar_lea.sflag [#allocation7], %s993_s6 }
  0x40   : > { %s997_s26 = scalar_lea.vmem [#allocation6], %s558_s15 }
  0x41   : > { %821 = dma.done.wait (%p1090_p2), %s191_s16, 2048  }
  0x42   : > { %823 = vsyncadd (%p1090_p2), %s191_s16, 4294965248  ;;  %v693_v0 = vld [vmem:[%s997_s26 + $0x78] sm:$0xff]   ;;  %v695_v2 = vld [vmem:[%s997_s26 + $0x70] sm:$0xff]   ;;  %s559_s17 = sshll.u32 %s993_s6, 3  ;;  %s581_s29 = sshll.u32 %s842_s12, 6 }
  0x43   : > { %v694_v1 = vld [vmem:[%s997_s26 + $0x38] sm:$0xff]   ;;  %591 = vmatprep.subr.bf16.mxu0 %v693_v0  ;;  %v696_v3 = vld [vmem:[%s997_s26 + $0x30] sm:$0xff]   ;;  %v697_v4 = vld [vmem:[%s997_s26 + $0x68] sm:$0xff]   ;;  %s214_s19 = scalar_lea.vmem [#allocation8], %s559_s17  ;;  %s1026_s25 = scalar_lea.hbm %s1076_s2, %s581_s29 }
  0x44   : > { %592 = vmatpush3.bf16.msra.mxu0 %v694_v1  ;;  %v698_v5 = vld [vmem:[%s997_s26 + $0x28] sm:$0xff]   ;;  %v699_v6 = vld [vmem:[%s997_s26 + $0x60] sm:$0xff]   ;;  %v701_v8 = vld [vmem:[%s997_s26 + $0x58] sm:$0xff]   ;;  %s444_s22 = sshll.u32 %s214_s19, 4  ;;  %s429_s28 = scalar_lea.sflag [#allocation5], %s993_s6  ;;  %s1021_s22 = int_to_ptr.vmem [resolvable:$true] %s444_s22 }
  0x45   : > { %593 = vmatprep.subr.bf16.mxu0 %v695_v2  ;;  %v700_v7 = vld [vmem:[%s997_s26 + $0x20] sm:$0xff]   ;;  %v702_v9 = vld [vmem:[%s997_s26 + $0x18] sm:$0xff]   ;;  %v703_v10 = vld [vmem:[%s997_s26 + $0x50] sm:$0xff]   ;;  %s766_s24 = scalar_lea.vmem %s1021_s22, 128  ;;  %p1091_p12 = scmp.ne.s32.totalorder %s1085_s20, 0 }
  0x46   : > { %v711_v11 = vld [vmem:[#allocation3 + $0x4] ss:$8 sps:$4 sm:$0xff]   ;;  %v705_v13 = vld [vmem:[%s997_s26 + $0x48] sm:$0xff]   ;;  %v707_v15 = vld [vmem:[%s997_s26 + $0x40] sm:$0xff]   ;;  %p767_p3 = scmp.ne.s32.totalorder %s1021_s22, %s766_s24  ;;  %s858_s12 = smov [#allocation8]  }
  0x47   : > { %v704_v12 = vld [vmem:[%s997_s26 + $0x10] sm:$0xff]   ;;  %400 = vmatprep.mubr.bf16.mxu0 %v711_v11  ;;  %v706_v14 = vld [vmem:[%s997_s26 + $0x8] sm:$0xff]   ;;  %v708_v16 = vld [vmem:[%s997_s26] sm:$0xff]   ;;  %s770_s30 = sshll.u32 %s858_s12, 4  ;;  %s771_s30 = int_to_ptr.vmem [resolvable:$false] %s770_s30 }
  0x48   : > { %594 = vmatpush3.bf16.msra.mxu0 %v696_v3  ;;  %v709_v17 = vld [vmem:[#allocation3] ss:$8 sps:$4 sm:$0xff]   ;;  %p768_p13 = pnand %p767_p3, %p1091_p12  ;;  %s772_s3 = scalar_lea.vmem %s771_s30, 256 }
  0x49   : > { %595 = vmatprep.subr.bf16.mxu0 %v697_v4  ;;  %p773_p6 = scmp.lt.s32.totalorder %s1021_s22, %s771_s30  ;;  %p774_p8 = scmp.lt.s32.totalorder %s772_s3, %s766_s24 }
  0x4a   : > { %p769_p4 = pneg %p768_p13 }
  0x4b   : > { %p775_p10 = por %p774_p8, %p773_p6 }
  0x4c   : > { %596 = vmatpush3.bf16.msra.mxu0 %v698_v5 }
  0x4d   : > { %597 = vmatprep.subr.bf16.mxu0 %v699_v6  ;;  %p776_p0 = pnand %p775_p10, %p769_p4 }
  0x50   : > { %598 = vmatpush3.bf16.msra.mxu0 %v700_v7 }
  0x51   : > { %599 = vmatprep.subr.bf16.mxu0 %v701_v8 }
  0x54   : > { %600 = vmatpush3.bf16.msra.mxu0 %v702_v9 }
  0x55   : > { %601 = vmatprep.subr.bf16.mxu0 %v703_v10 }
  0x58   : > { %602 = vmatpush3.bf16.msra.mxu0 %v704_v12 }
  0x59   : > { %603 = vmatprep.subr.bf16.mxu0 %v705_v13 }
  0x5c   : > { %604 = vmatpush3.bf16.msra.mxu0 %v706_v14 }
  0x5d   : > { %605 = vmatprep.subr.bf16.mxu0 %v707_v15 }
  0x60   : > { %606 = vmatpush3.bf16.msra.mxu0 %v708_v16 }
  0x63   : > { %401 = vmatmul.mubr.bf16.vlgmr.msra.gmra.mxu0 %v709_v17 }
 0x123   : > { %v607_v18 = vpop.f32.mrf.mxu0 }
 0x125   : > { %v608_v19 = vpop.f32.mrf.mxu0 }
 0x126   : > { %v609_v22 = vadd.f32 %v608_v19, %v607_v18 }
 0x127   : > { %v610_v20 = vpop.f32.mrf.mxu0 }
 0x129   : > { %v611_v21 = vpop.f32.mrf.mxu0 }
 0x12a   : > { %v612_v23 = vadd.f32 %v611_v21, %v610_v20 }
 0x12c   : > { %v589_v24 = vpack.c.bf16 %v612_v23, %v609_v22 }
 0x12e   : > { %590 = vst [vmem:[%s214_s19] sm:$0xff] %v589_v24  }
 0x12f   : > { %779 = shalt.err (!%p776_p0)
}
 0x130   : > { %s780_s4 = scalar_lea.hbm %s1026_s25, 128  ;;  %s784_s5 = scalar_lea.hbm %s1076_s2, 256 }
 0x131   : > { %p781_p1 = scmp.ne.s32.totalorder %s1026_s25, %s780_s4  ;;  %p785_p9 = scmp.lt.s32.totalorder %s1026_s25, %s1076_s2 }
 0x132   : > { %p786_p11 = scmp.lt.s32.totalorder %s784_s5, %s780_s4 }
 0x133   : > { %p782_p5 = pnand %p781_p1, %p1091_p12 }
 0x134   : > { %p787_p2 = por %p786_p11, %p785_p9 }
 0x135   : > { %p783_p7 = pneg %p782_p5 }
 0x137   : > { %p788_p3 = pnand %p787_p2, %p783_p7 }
 0x139   : > { %791 = shalt.err (!%p788_p3)
}
 0x13a   : > { %s859_s26 = smov 64   ;;  %s860_s17 = smov 128  }
 0x13b   : > { %s861_s19 = smov 4  }
 0x13c   : > { %619 = dma.vmem_to_hbm [thread:$0]  (%p1091_p12), %s1021_s22, 128, %s1026_s25, %s429_s28, %s859_s26, %s860_s17, %s861_s19  }
 0x13d PF: > { %s1092_s29 = sld [smem:[#allocation12_spill]]  ;;  %s459_s18 = sand.u32 1, %s830_s9  }
 0x13e   : > { %p1093_p13 = scmp.ne.s32.totalorder %s1086_s21, 0  ;;  %s460_s23 = scalar_lea.sflag [#allocation5], %s459_s18 }
 0x143   : > { %p1094_p4 = scmp.ge.s32.totalorder %s1092_s29, 2 }
 0x145   : > { %p630_p6 = pnand %p1094_p4, %p1093_p13 }
 0x147   : > { %p631_p8 = pneg %p630_p6 }
 0x149   : > { %825 = dma.done.wait (%p631_p8), %s460_s23, 128  }
 0x14a   : > { %827 = vsyncadd (%p631_p8), %s460_s23, 4294967168  ;;  %s19_s24 = sadd.s32 1, %s1092_s29   ;;  %s1095_s9 = smov %s834_s10 }
 0x14b   : > { %p16_p10 = scmp.ge.s32.totalorder %s19_s24, 4   ;;  %s1096_s10 = smov %s838_s11 }
 0x14c   : > { %s1097_s11 = smov %s979_s14  ;;  %s1098_s12 = smov %s846_s13 }
 0x14d   : > { %s1099_s13 = smov %s1102_s27  ;;  %s1100_s14 = smov %s19_s24 }
 0x14e   :  { %18 = sbr.rel (!%p16_p10) target bundleno = 7 (0x7), region = 87 }
 0x153   :  { %465 = vsyncpa [#allocation4], 1 }
 0x154   :  { %467 = vsyncpa [#allocation4 + $0x1], 1 }
 0x155   :  { %468 = vsyncpa [#allocation7], 1 }
 0x156   :  { %470 = vsyncpa [#allocation7 + $0x1], 1 }
 0x157   :  { %471 = vsyncpa [#allocation5], 1 }
 0x158   :  { %473 = vsyncpa [#allocation5 + $0x1], 1 }

</bundles_post_ra>
